<compile_context>
chip_gen: v6e
topology: v6e:2x2x1
jax: 0.10.0
libtpu: 0.0.40
codegen_flags: <defaults>
</compile_context>

<pallas_src>
import numpy as np
import jax
import jax.numpy as jnp
from jax.experimental import pallas as pl
from jax.experimental.pallas import tpu as pltpu


def _interp_matrix(in_size: int, out_size: int) -> np.ndarray:
    """Interpolation matrix matching F.interpolate(..., align_corners=True)."""
    W = np.zeros((out_size, in_size), dtype=np.float32)
    if out_size == 1:
        W[0, 0] = 1.0
        return W
    ratio = (in_size - 1) / (out_size - 1)
    for i in range(out_size):
        src = i * ratio
        i0 = min(max(int(np.floor(src)), 0), in_size - 1)
        i1 = min(i0 + 1, in_size - 1)
        w1 = src - i0
        W[i, i0] += 1.0 - w1
        W[i, i1] += w1
    return W


def _resize_kernel(wy_ref, wxt_ref, x_ref, o_ref):
    # x block: (bt, H, W) images straight from NCHW HBM (no host relayout).
    bt, h, w = x_ref.shape
    wy = wy_ref[...]            # (Hout, H), `factor` already folded in
    wxt = wxt_ref[...]          # (W, Wout)
    if h % 8 == 0:
        # W-axis interpolation for all bt images in one MXU matmul.
        # (The (bt,H,W)->(bt*H,W) merge is sublane-aligned, hence free.)
        xw = jnp.dot(x_ref[...].reshape(bt * h, w), wxt,
                     preferred_element_type=jnp.float32)              # (bt*H, Wout)
        for j in range(bt):                                           # bt is small & static
            o_ref[j] = jnp.dot(wy, xw[j * h:(j + 1) * h, :],
                               preferred_element_type=jnp.float32).astype(o_ref.dtype)
    else:
        # Fallback for H not a multiple of 8: per-image on both axes.
        for j in range(bt):
            t = jnp.dot(x_ref[j], wxt, preferred_element_type=jnp.float32)
            o_ref[j] = jnp.dot(wy, t,
                               preferred_element_type=jnp.float32).astype(o_ref.dtype)


def _vmem_budget_bytes() -> int:
    """Usable VMEM per generation: ~48 MiB on v7x (64 MiB phys), ~96 MiB on v5e/v6e."""
    try:
        cap = int(pltpu.get_tpu_info().vmem_capacity_bytes)
    except Exception:
        cap = 64 * 2**20            # conservative fallback (v7x-sized)
    return min((cap * 3) // 4, 100 * 2**20)


def _padded_slab_bytes(rows: int, cols: int) -> int:
    """Conservative f32 (8,128)-tiled VMEM footprint of one 2-D image slab."""
    return (-(-rows // 8) * 8) * (-(-cols // 128) * 128) * 4


def _choose_bt(b: int, h: int, w: int, h_out: int, w_out: int, budget: int) -> int:
    """Images per grid step: fits VMEM, keeps the unrolled loop short, >=2 grid steps."""
    per_img = _padded_slab_bytes(h, w) + _padded_slab_bytes(h_out, w_out)
    bt_vmem = max(1, (budget * 3 // 4) // (2 * per_img))   # double-buffered in+out blocks
    bt_cap = min(bt_vmem, 32)                              # bound trace/compile cost
    if b >= 2:
        bt_cap = min(bt_cap, b // 2)                       # >=2 grid steps (v7x: 2 TCs)
    bt_cap = max(1, bt_cap)
    for cand in range(bt_cap, 0, -1):                      # divisor of b -> exact tiling
        if b % cand == 0:
            return cand
    return 1


def resize_transform(x: jax.Array, vel_resize: float) -> jax.Array:
    """ResizeTransform.forward for ndims=2 (bilinear). x is NCHW."""
    factor = 1.0 / vel_resize
    if factor == 1.0:
        return x

    n, c, h, w = x.shape
    h_out = int(np.floor(h * factor))
    w_out = int(np.floor(w * factor))
    b = n * c

    # Host-built constants (a few KiB): factor folded into Wy, Wx pre-transposed.
    wy = (_interp_matrix(h, h_out) * np.float32(factor)).astype(np.float32)      # (Hout, H)
    wxt = np.ascontiguousarray(_interp_matrix(w, w_out).T).astype(np.float32)    # (W, Wout)

    budget = _vmem_budget_bytes()
    bt = _choose_bt(b, h, w, h_out, w_out, budget)
    grid = (b // bt,)

    # Leading-dim reshape only (bitcast): no transpose / pad / extra HBM copies.
    x3d = x.reshape(b, h, w)

    out3d = pl.pallas_call(
        _resize_kernel,
        out_shape=jax.ShapeDtypeStruct((b, h_out, w_out), x.dtype),
        grid=grid,
        in_specs=[
            pl.BlockSpec((h_out, h), lambda i: (0, 0)),        # factor*Wy (shared, tiny)
            pl.BlockSpec((w, w_out), lambda i: (0, 0)),        # Wx^T      (shared, tiny)
            pl.BlockSpec((bt, h, w), lambda i: (i, 0, 0)),     # bt input images (NCHW)
        ],
        out_specs=pl.BlockSpec((bt, h_out, w_out), lambda i: (i, 0, 0)),
        compiler_params=pltpu.CompilerParams(
            dimension_semantics=("parallel",),
            vmem_limit_bytes=int(budget),
        ),
    )(jnp.asarray(wy), jnp.asarray(wxt), x3d)

    return out3d.reshape(n, c, h_out, w_out)


def _reference(x: np.ndarray, vel_resize: float) -> np.ndarray:
    """NumPy reference of the same forward pass (PyTorch scale/interp ordering)."""
    factor = 1.0 / vel_resize
    if factor == 1.0:
        return x
    n, c, h, w = x.shape
    h_out = int(np.floor(h * factor))
    w_out = int(np.floor(w * factor))
    wy = _interp_matrix(h, h_out)
    wx = _interp_matrix(w, w_out)
    xf = x.astype(np.float32)
    if factor > 1.0:
        xf = factor * xf
    out = np.einsum("oh,nchw,pw->ncop", wy, xf, wx)
    if factor < 1.0:
        out = factor * out
    return out


if __name__ == "__main__":
    key = jax.random.PRNGKey(0)
    # vel_resize=0.5 -> factor=2.0 (upsample 16x16 -> 32x32); batch=2, channels=4.
    x = jax.random.normal(key, (2, 4, 16, 16), dtype=jnp.float32)
    vel_resize = 0.5

    y = resize_transform(x, vel_resize)
    y = jax.block_until_ready(y)

    assert y.shape == (2, 4, 32, 32), y.shape
    y_ref = _reference(np.asarray(x), vel_resize)
    np.testing.assert_allclose(np.asarray(y), y_ref, rtol=1e-5, atol=1e-5)

    print("KERNEL_OK")
</pallas_src>

<mosaic_0001>
module attributes {stable_mosaic.version = 11 : i64} {
  func.func @_resize_kernel(%arg0: i32, %arg1: memref<32x16xf32, #tpu.memory_space<vmem>>, %arg2: memref<16x32xf32, #tpu.memory_space<vmem>>, %arg3: memref<4x16x16xf32, #tpu.memory_space<vmem>>, %arg4: memref<4x32x32xf32, #tpu.memory_space<vmem>>) attributes {dimension_semantics = [#tpu.dimension_semantics<parallel>], iteration_bounds = array<i64: 2>, scalar_prefetch = 0 : i64, scratch_operands = 0 : i64, tpu.core_type = #tpu.core_type<tc>, window_params = [{pipeline_mode = #tpu.pipeline_mode<synchronous>, transform_indices = @transform_0, window_bounds = array<i64: 32, 16>}, {pipeline_mode = #tpu.pipeline_mode<synchronous>, transform_indices = @transform_1, window_bounds = array<i64: 16, 32>}, {transform_indices = @transform_2, window_bounds = array<i64: 4, 16, 16>}, {transform_indices = @transform_3, window_bounds = array<i64: 4, 32, 32>}]} {
    %c0 = arith.constant 0 : index
    %c0_0 = arith.constant 0 : index
    %0 = vector.load %arg1[%c0, %c0_0] : memref<32x16xf32, #tpu.memory_space<vmem>>, vector<32x16xf32>
    %c0_1 = arith.constant 0 : index
    %c0_2 = arith.constant 0 : index
    %1 = vector.load %arg2[%c0_1, %c0_2] : memref<16x32xf32, #tpu.memory_space<vmem>>, vector<16x32xf32>
    %c0_3 = arith.constant 0 : index
    %c0_4 = arith.constant 0 : index
    %c0_5 = arith.constant 0 : index
    %2 = vector.load %arg3[%c0_3, %c0_4, %c0_5] : memref<4x16x16xf32, #tpu.memory_space<vmem>>, vector<4x16x16xf32>
    %3 = vector.shape_cast %2 : vector<4x16x16xf32> to vector<64x16xf32>
    %cst = arith.constant dense<0.000000e+00> : vector<64x32xf32>
    %4 = tpu.matmul %3, %1, %cst {dimension_numbers = #tpu.dot_dimension_numbers<[1], [0], [0], [1], [0, 0, 1, 1], [], []>} : vector<64x16xf32>, vector<16x32xf32>, vector<64x32xf32> -> vector<64x32xf32>
    %5 = vector.extract_strided_slice %4 {offsets = [0, 0], sizes = [16, 32], strides = [1, 1]} : vector<64x32xf32> to vector<16x32xf32>
    %cst_6 = arith.constant dense<0.000000e+00> : vector<32x32xf32>
    %6 = tpu.matmul %0, %5, %cst_6 {dimension_numbers = #tpu.dot_dimension_numbers<[1], [0], [0], [1], [0, 0, 1, 1], [], []>} : vector<32x16xf32>, vector<16x32xf32>, vector<32x32xf32> -> vector<32x32xf32>
    %c0_7 = arith.constant 0 : index
    %c0_8 = arith.constant 0 : index
    %c0_9 = arith.constant 0 : index
    %7 = vector.load %arg4[%c0_7, %c0_8, %c0_9] : memref<4x32x32xf32, #tpu.memory_space<vmem>>, vector<1x32x32xf32>
    %8 = vector.shape_cast %7 : vector<1x32x32xf32> to vector<32x32xf32>
    %9 = vector.shape_cast %6 : vector<32x32xf32> to vector<1x32x32xf32>
    tpu.vector_store %arg4[%c0_7, %c0_8, %c0_9], %9 {strides = array<i32>} : memref<4x32x32xf32, #tpu.memory_space<vmem>>, vector<1x32x32xf32>,
    %10 = vector.extract_strided_slice %4 {offsets = [16, 0], sizes = [16, 32], strides = [1, 1]} : vector<64x32xf32> to vector<16x32xf32>
    %cst_10 = arith.constant dense<0.000000e+00> : vector<32x32xf32>
    %11 = tpu.matmul %0, %10, %cst_10 {dimension_numbers = #tpu.dot_dimension_numbers<[1], [0], [0], [1], [0, 0, 1, 1], [], []>} : vector<32x16xf32>, vector<16x32xf32>, vector<32x32xf32> -> vector<32x32xf32>
    %c1 = arith.constant 1 : index
    %c0_11 = arith.constant 0 : index
    %c0_12 = arith.constant 0 : index
    %12 = vector.load %arg4[%c1, %c0_11, %c0_12] : memref<4x32x32xf32, #tpu.memory_space<vmem>>, vector<1x32x32xf32>
    %13 = vector.shape_cast %12 : vector<1x32x32xf32> to vector<32x32xf32>
    %14 = vector.shape_cast %11 : vector<32x32xf32> to vector<1x32x32xf32>
    tpu.vector_store %arg4[%c1, %c0_11, %c0_12], %14 {strides = array<i32>} : memref<4x32x32xf32, #tpu.memory_space<vmem>>, vector<1x32x32xf32>,
    %15 = vector.extract_strided_slice %4 {offsets = [32, 0], sizes = [16, 32], strides = [1, 1]} : vector<64x32xf32> to vector<16x32xf32>
    %cst_13 = arith.constant dense<0.000000e+00> : vector<32x32xf32>
    %16 = tpu.matmul %0, %15, %cst_13 {dimension_numbers = #tpu.dot_dimension_numbers<[1], [0], [0], [1], [0, 0, 1, 1], [], []>} : vector<32x16xf32>, vector<16x32xf32>, vector<32x32xf32> -> vector<32x32xf32>
    %c2 = arith.constant 2 : index
    %c0_14 = arith.constant 0 : index
    %c0_15 = arith.constant 0 : index
    %17 = vector.load %arg4[%c2, %c0_14, %c0_15] : memref<4x32x32xf32, #tpu.memory_space<vmem>>, vector<1x32x32xf32>
    %18 = vector.shape_cast %17 : vector<1x32x32xf32> to vector<32x32xf32>
    %19 = vector.shape_cast %16 : vector<32x32xf32> to vector<1x32x32xf32>
    tpu.vector_store %arg4[%c2, %c0_14, %c0_15], %19 {strides = array<i32>} : memref<4x32x32xf32, #tpu.memory_space<vmem>>, vector<1x32x32xf32>,
    %20 = vector.extract_strided_slice %4 {offsets = [48, 0], sizes = [16, 32], strides = [1, 1]} : vector<64x32xf32> to vector<16x32xf32>
    %cst_16 = arith.constant dense<0.000000e+00> : vector<32x32xf32>
    %21 = tpu.matmul %0, %20, %cst_16 {dimension_numbers = #tpu.dot_dimension_numbers<[1], [0], [0], [1], [0, 0, 1, 1], [], []>} : vector<32x16xf32>, vector<16x32xf32>, vector<32x32xf32> -> vector<32x32xf32>
    %c3 = arith.constant 3 : index
    %c0_17 = arith.constant 0 : index
    %c0_18 = arith.constant 0 : index
    %22 = vector.load %arg4[%c3, %c0_17, %c0_18] : memref<4x32x32xf32, #tpu.memory_space<vmem>>, vector<1x32x32xf32>
    %23 = vector.shape_cast %22 : vector<1x32x32xf32> to vector<32x32xf32>
    %24 = vector.shape_cast %21 : vector<32x32xf32> to vector<1x32x32xf32>
    tpu.vector_store %arg4[%c3, %c0_17, %c0_18], %24 {strides = array<i32>} : memref<4x32x32xf32, #tpu.memory_space<vmem>>, vector<1x32x32xf32>,
    return
  }
  func.func @transform_0(%arg0: i32) -> (i32, i32) {
    %c0_i32 = arith.constant 0 : i32
    %c0_i32_0 = arith.constant 0 : i32
    %c0_i32_1 = arith.constant 0 : i32
    return %c0_i32, %c0_i32_0 : i32, i32
  }
  func.func @transform_1(%arg0: i32) -> (i32, i32) {
    %c0_i32 = arith.constant 0 : i32
    %c0_i32_0 = arith.constant 0 : i32
    %c0_i32_1 = arith.constant 0 : i32
    return %c0_i32, %c0_i32_0 : i32, i32
  }
  func.func @transform_2(%arg0: i32) -> (i32, i32, i32) {
    %c0_i32 = arith.constant 0 : i32
    %c0_i32_0 = arith.constant 0 : i32
    %c0_i32_1 = arith.constant 0 : i32
    return %arg0, %c0_i32, %c0_i32_0 : i32, i32, i32
  }
  func.func @transform_3(%arg0: i32) -> (i32, i32, i32) {
    %c0_i32 = arith.constant 0 : i32
    %c0_i32_0 = arith.constant 0 : i32
    %c0_i32_1 = arith.constant 0 : i32
    return %arg0, %c0_i32, %c0_i32_0 : i32, i32, i32
  }
}

</mosaic_0001>

<bundles_post_ra>
// kernel: tpu_custom_call.1
= control target key start
LH: loop header
LB: loop body
LE: loop exit
PB: predicated region body
PF: predicated region fallthrough
CT: control target
= control target key end

     0   :  { %8 = vsyncpa [#allocation3], 0  ;;  %s1344_s0 = inlined_call_operand.vmem [shape: f32[32,16], index: 0, kind: input, shape index: {}]   ;;  %s1345_s1 = inlined_call_operand.vmem [shape: f32[16,32], index: 1, kind: input, shape index: {}]   ;;  %s1346_s2 = inlined_call_operand.hbm [shape: f32[8,16,16], index: 2, kind: input, shape index: {}]   ;;  %s1347_s3 = inlined_call_operand.hbm [shape: f32[8,32,32], index: 3, kind: output, shape index: {}]  }
   0x1   :  { %10 = vsyncpa [#allocation3 + $0x1], 0 }
   0x2   :  { %11 = vsyncpa [#allocation4], 0 }
   0x3   :  { %13 = vsyncpa [#allocation4 + $0x1], 0  ;;  %s1112_s12 = smov 0   ;;  %s1114_s13 = smov 0  }
   0x4   :  { %s1116_s14 = smov 0   ;;  %s1118_s15 = smov 0  }
   0x5 LB: > { %s1133_s16 = sadd.s32 4294967295, %s1084_s15   ;;  %s796_s17 = sadd.s32 4294967294, %s1084_s15   ;;  %s1084_s15 = sphi %s1118_s15, %s1362_s15   ;;  %s1080_s14 = sphi %s1116_s14, %s1361_s14   ;;  %s1076_s13 = sphi %s1114_s13, %s1360_s13   ;;  %s1072_s12 = sphi %s1112_s12, %s1359_s12  }
   0x6   : > { %s1137_s18 = sadd.s32 1, %s1084_s15   ;;  %s68_s19 = sadd.s32 1, %s1080_s14 }
   0x7   : > { %s65_s20 = ssub.s32 %s1084_s15, %s1137_s18  ;;  %p75_p0 = scmp.ne.s32.totalorder %s1080_s14, %s1076_s13 }
   0x8   : > { %p66_p1 = scmp.eq.s32.totalorder %s65_s20, 0  ;;  %p76_p2 = scmp.eq.s32.totalorder %s1084_s15, 0 }
   0x9   : > { %p81_p3 = scmp.ne.s32.totalorder %s1076_s13, %s1072_s12  ;;  %p82_p4 = scmp.eq.s32.totalorder %s1133_s16, 0 }
   0xa   : > { %s1149_s21 = scalar_select %p66_p1, %s1080_s14, %s68_s19  }
   0xb   : > { %p1151_p5 = por %p76_p2, %p75_p0  ;;  %p1155_p6 = por %p82_p4, %p81_p3 }
   0xc   : > { %p105_p7 = scmp.eq.s32.totalorder %s1133_s16, 1  ;;  %p111_p8 = scmp.eq.s32.totalorder %s796_s17, 1 }
   0xd   : > { %s1351_s23 = scalar_select %p1155_p6, 1, 0 }
   0xe   : > { %p954_p10 = scmp.lt.s32.totalorder %s1084_s15, 2  ;;  %p1162_p11 = por %p105_p7, %p75_p0 }
   0xf   : > { %p1166_p12 = por %p111_p8, %p81_p3  ;;  %s137_s26 = sand.u32 1, %s1080_s14  }
  0x10   : > { %s1352_s24 = scalar_select %p1162_p11, 1, 0 }
  0x11   : > { %s1353_s25 = scalar_select %p1166_p12, 1, 0 }
  0x12   : > { %s849_s27 = sshll.u32 %s1084_s15, 10  ;;  %s799_s28 = sshll.u32 %s137_s26, 6 }
  0x13   : > { %s1175_s4 = scalar_lea.hbm %s1346_s2, %s849_s27  ;;  %s141_s5 = scalar_lea.vmem [#allocation2], %s799_s28 }
  0x14   : > { %s149_s6 = sshll.u32 %s141_s5, 4  ;;  %p1179_p13 = pnand %p954_p10, %p1151_p5  ;;  %s1183_s6 = int_to_ptr.vmem [resolvable:$true] %s149_s6 }
  0x15   : > { %s1185_s8 = scalar_lea.sflag [#allocation3], %s137_s26  ;;  %s992_s9 = scalar_lea.hbm %s1175_s4, 1024 }
  0x16   : > { %p993_p0 = scmp.ne.s32.totalorder %s1175_s4, %s992_s9  ;;  %p994_p1 = pneg %p1179_p13 }
  0x17   : > { %s997_s17 = scalar_lea.hbm %s1346_s2, 2048  ;;  %p998_p4 = scmp.lt.s32.totalorder %s1175_s4, %s1346_s2 }
  0x18   : > { %p995_p2 = pnand %p994_p1, %p993_p0  ;;  %p999_p5 = scmp.lt.s32.totalorder %s997_s17, %s992_s9 }
  0x1a   : > { %p996_p3 = pneg %p995_p2  ;;  %p1000_p7 = por %p999_p5, %p998_p4 }
  0x1c   : > { %p1001_p8 = pnand %p1000_p7, %p996_p3 }
  0x1e   : > { %1004 = shalt.err (!%p1001_p8)
}
  0x1f   : > { %s1005_s22 = scalar_lea.vmem %s1183_s6, 1024  ;;  %s1086_s26 = smov [#allocation2]  }
  0x20   : > { %p1006_p10 = scmp.ne.s32.totalorder %s1183_s6, %s1005_s22  ;;  %s1010_s27 = sshll.u32 %s1086_s26, 4  ;;  %s1011_s27 = int_to_ptr.vmem [resolvable:$false] %s1010_s27 }
  0x21   : > { %s1012_s28 = scalar_lea.vmem %s1011_s27, 2048  ;;  %p1013_p2 = scmp.lt.s32.totalorder %s1183_s6, %s1011_s27 }
  0x22   : > { %p1008_p9 = pnand %p1006_p10, %p994_p1  ;;  %p1014_p12 = scmp.lt.s32.totalorder %s1012_s28, %s1005_s22 }
  0x24   : > { %p1009_p0 = pneg %p1008_p9  ;;  %p1015_p11 = por %p1014_p12, %p1013_p2 }
  0x26   : > { %p1016_p6 = pnand %p1015_p11, %p1009_p0 }
  0x28   : > { %1019 = shalt.err (!%p1016_p6)
}
  0x29   : > { %s1087_s29 = smov 128   ;;  %s1088_s30 = smov 8  }
  0x2a   : > { %949 = dma.hbm_to_vmem [thread:$0]  (!%p1179_p13), %s1175_s4, 1024, %s1183_s6, %s1185_s8, %s1087_s29, %s1087_s29, %s1088_s30  }
  0x2b   : > { %p803_p9 = scmp.ge.s32.totalorder %s1084_s15, 1  ;;  %p157_p1 = scmp.lt.s32.totalorder %s1084_s15, 3 }
  0x2d   : > { %p158_p3 = pnand %p803_p9, %p157_p1 }
  0x2e   : > { %s1209_s5 = sand.u32 (!%p158_p3), 1, %s1076_s13   ;;  %p1355_p6 = scmp.ne.s32.totalorder (!%p158_p3), %s1351_s23, 0 }
  0x2f   : > { %161 = sbr.rel (%p158_p3) target bundleno = 484 (0x1e4), region = 32  ;;  %s804_s9 = sshll.u32 (!%p158_p3), %s1209_s5, 6 }
  0x30   : > { %s164_s10 = scalar_lea.sflag (!%p158_p3), [#allocation3], %s1209_s5  ;;  %s167_s11 = scalar_lea.vmem (!%p158_p3), [#allocation2], %s804_s9 }
  0x34   : > { %1063 = dma.done.wait (%p1355_p6), %s164_s10, 1024  }
  0x35   : > { %1065 = vsyncadd (%p1355_p6), %s164_s10, 4294966272  ;;  %vm206_vm0 = vcmask 130048   ;;  %v197_v0 = vld [vmem:[%s1345_s1 + $0x8] sm:$0xff]  ;;  %v196_v1 = vld [vmem:[%s1345_s1] sm:$0xff]  ;;  %s805_s29 = sshll.u32 %s1209_s5, 7  ;;  %vm433_vm1 = vcmask 261120  }
  0x36   : > { %v198_v2 = vld [vmem:[%s167_s11] sm:$0xff]  ;;  %886 = vmatprep.subr.mxu0 %v197_v0  ;;  %v199_v3 = vld [vmem:[%s167_s11 + $0x8] sm:$0xff]  ;;  %v200_v4 = vld [vmem:[%s167_s11 + $0x10] sm:$0xff]  ;;  %s1260_s30 = scalar_lea.vmem [#allocation5], %s805_s29  ;;  %s851_s9 = sshll.u32 %s1133_s16, 11 }
  0x37   : > { %890 = vmatprep.mubr.msk.f32.mxu0 %vm206_vm0, %v198_v2  ;;  %887 = vmatpush3.msra.mxu0 %v197_v0  ;;  %v201_v5 = vld [vmem:[%s167_s11 + $0x18] sm:$0xff]  ;;  %v202_v6 = vld [vmem:[%s167_s11 + $0x20] sm:$0xff]  ;;  %v203_v7 = vld [vmem:[%s167_s11 + $0x28] sm:$0xff]  ;;  %s723_s10 = sshll.u32 %s1260_s30, 4  ;;  %s1295_s6 = scalar_lea.hbm %s1347_s3, %s851_s9  ;;  %s1297_s10 = int_to_ptr.vmem [resolvable:$true] %s723_s10 }
  0x38   : > { %888 = vmatprep.subr.mxu0 %v196_v1  ;;  %v204_v8 = vld [vmem:[%s167_s11 + $0x30] sm:$0xff]  ;;  %v205_v9 = vld [vmem:[%s167_s11 + $0x38] sm:$0xff]  ;;  %v192_v10 = vld [vmem:[%s1344_s0] sm:$0xff]  ;;  %s709_s16 = scalar_lea.sflag [#allocation4], %s1209_s5  ;;  %s1020_s7 = scalar_lea.vmem %s1297_s10, 2048 }
  0x39   : > { %889 = vmatpush3.msra.mxu0 %v196_v1  ;;  %906 = vmatprep.mubr.msk.f32.mxu1 %vm206_vm0, %v192_v10  ;;  %v193_v13 = vld [vmem:[%s1344_s0 + $0x8] sm:$0xff]  ;;  %v194_v14 = vld [vmem:[%s1344_s0 + $0x10] sm:$0xff]  ;;  %v195_v17 = vld [vmem:[%s1344_s0 + $0x18] sm:$0xff]  ;;  %p1021_p11 = scmp.ne.s32.totalorder %s1297_s10, %s1020_s7  ;;  %p1356_p12 = scmp.ne.s32.totalorder %s1352_s24, 0 }
  0x3a   : > { %891 = vmatmul.mubr.msk.f32.vlgmr.msra.gmra.mxu0 %vm206_vm0, %v199_v3  ;;  %s1089_s8 = smov [#allocation5]  }
  0x3b   : > { %893 = vmatprep.mubr.msk.f32.mxu0 %vm206_vm0, %v200_v4  ;;  %p1022_p13 = pnand %p1021_p11, %p1356_p12  ;;  %s1024_s23 = sshll.u32 %s1089_s8, 4  ;;  %s1025_s23 = int_to_ptr.vmem [resolvable:$false] %s1024_s23 }
  0x3c   : > { %s1026_s17 = scalar_lea.vmem %s1025_s23, 4096  ;;  %p1027_p5 = scmp.lt.s32.totalorder %s1297_s10, %s1025_s23 }
  0x3d   : > { %p1023_p4 = pneg %p1022_p13  ;;  %p1028_p7 = scmp.lt.s32.totalorder %s1026_s17, %s1020_s7 }
  0x3e   : > { %894 = vmatmul.mubr.msk.f32.gmra.mxu0 %vm206_vm0, %v201_v5 }
  0x3f   : > { %896 = vmatprep.mubr.msk.f32.mxu0 %vm206_vm0, %v202_v6  ;;  %p1029_p8 = por %p1028_p7, %p1027_p5 }
  0x41   : > { %p1030_p10 = pnand %p1029_p8, %p1023_p4 }
  0x42   : > { %897 = vmatmul.mubr.msk.f32.gmra.mxu0 %vm206_vm0, %v203_v7 }
  0x43   : > { %899 = vmatprep.mubr.msk.f32.mxu0 %vm206_vm0, %v204_v8 }
  0x46   : > { %900 = vmatmul.mubr.msk.f32.gmra.mxu0 %vm206_vm0, %v205_v9 }
  0x47   : > { %926 = vmatprep.mubr.msk.f32.mxu0 %vm206_vm0, %v192_v10 }
  0xfa   : > { %v892_v11 = vpop.f32.mrf.mxu0 }
  0xfb   : > { %902 = vmatprep.subr.mxu1 %v892_v11 }
  0xfc   : > { %v297_v12 = vpop.f32.mrf.mxu0  ;;  %903 = vmatpush3.msra.mxu1 %v892_v11 }
  0xfd   : > { %904 = vmatprep.subr.mxu1 %v297_v12 }
  0xfe   : > { %v895_v15 = vpop.f32.mrf.mxu0  ;;  %905 = vmatpush3.msra.mxu1 %v297_v12 }
  0xff   : > { %912 = vmatprep.subr.mxu1 %v895_v15  ;;  %907 = vmatmul.mubr.msk.f32.vlgmr.msra.gmra.mxu1 %vm206_vm0, %v193_v13 }
 0x100   : > { %v307_v16 = vpop.f32.mrf.mxu0  ;;  %913 = vmatpush3.msra.mxu1 %v895_v15  ;;  %909 = vmatprep.mubr.msk.f32.mxu1 %vm206_vm0, %v194_v14 }
 0x101   : > { %914 = vmatprep.subr.mxu1 %v307_v16 }
 0x102   : > { %v898_v18 = vpop.f32.mrf.mxu0  ;;  %915 = vmatpush3.msra.mxu1 %v307_v16 }
 0x103   : > { %922 = vmatprep.subr.mxu0 %v898_v18  ;;  %910 = vmatmul.mubr.msk.f32.gmra.mxu1 %vm206_vm0, %v195_v17 }
 0x104   : > { %v317_v19 = vpop.f32.mrf.mxu0  ;;  %923 = vmatpush3.msra.mxu0 %v898_v18  ;;  %916 = vmatprep.mubr.msk.f32.mxu1 %vm206_vm0, %v192_v10 }
 0x105   : > { %924 = vmatprep.subr.mxu0 %v317_v19 }
 0x106   : > { %925 = vmatpush3.msra.mxu0 %v317_v19  ;;  %v901_v20 = vpop.f32.mrf.mxu0 }
 0x107   : > { %932 = vmatprep.subr.mxu1 %v901_v20  ;;  %917 = vmatmul.mubr.msk.f32.vlgmr.msra.gmra.mxu1 %vm206_vm0, %v193_v13 }
 0x108   : > { %v327_v21 = vpop.f32.mrf.mxu0  ;;  %933 = vmatpush3.msra.mxu1 %v901_v20  ;;  %919 = vmatprep.mubr.msk.f32.mxu1 %vm206_vm0, %v194_v14 }
 0x109   : > { %934 = vmatprep.subr.mxu1 %v327_v21  ;;  %927 = vmatmul.mubr.msk.f32.vlgmr.msra.gmra.mxu0 %vm206_vm0, %v193_v13 }
 0x10a   : > { %935 = vmatpush3.msra.mxu1 %v327_v21  ;;  %929 = vmatprep.mubr.msk.f32.mxu0 %vm206_vm0, %v194_v14 }
 0x10b   : > { %920 = vmatmul.mubr.msk.f32.gmra.mxu1 %vm206_vm0, %v195_v17 }
 0x10c   : > { %936 = vmatprep.mubr.msk.f32.mxu1 %vm206_vm0, %v192_v10 }
 0x10d   : > { %930 = vmatmul.mubr.msk.f32.gmra.mxu0 %vm206_vm0, %v195_v17 }
 0x10f   : > { %937 = vmatmul.mubr.msk.f32.vlgmr.msra.gmra.mxu1 %vm206_vm0, %v193_v13 }
 0x110   : > { %939 = vmatprep.mubr.msk.f32.mxu1 %vm206_vm0, %v194_v14 }
 0x113   : > { %940 = vmatmul.mubr.msk.f32.gmra.mxu1 %vm206_vm0, %v195_v17 }
 0x1bf   : > { %v908_v22 = vpop.f32.mrf.mxu1 }
 0x1c0   : > { %435 = vst.msk [vmem:[%s1260_s30 + $0x8] sm:$0xff] %vm433_vm1, %v908_v22 }
 0x1c1   : > { %v414_v23 = vpop.f32.mrf.mxu1 }
 0x1c2   : > { %434 = vst.msk [vmem:[%s1260_s30] sm:$0xff] %vm433_vm1, %v414_v23 }
 0x1c3   : > { %v911_v24 = vpop.f32.mrf.mxu1 }
 0x1c4   : > { %437 = vst.msk [vmem:[%s1260_s30 + $0x18] sm:$0xff] %vm433_vm1, %v911_v24 }
 0x1c5   : > { %v424_v25 = vpop.f32.mrf.mxu1 }
 0x1c6   : > { %436 = vst.msk [vmem:[%s1260_s30 + $0x10] sm:$0xff] %vm433_vm1, %v424_v25 }
 0x1c7   : > { %v918_v26 = vpop.f32.mrf.mxu1 }
 0x1c8   : > { %823 = vst.msk [vmem:[%s1260_s30 + $0x28] sm:$0xff] %vm433_vm1, %v918_v26 }
 0x1c9   : > { %v504_v27 = vpop.f32.mrf.mxu1  ;;  %v928_v28 = vpop.f32.mrf.mxu0 }
 0x1ca   : > { %822 = vst.msk [vmem:[%s1260_s30 + $0x20] sm:$0xff] %vm433_vm1, %v504_v27  ;;  %831 = vst.msk [vmem:[%s1260_s30 + $0x48] sm:$0xff] %vm433_vm1, %v928_v28 }
 0x1cb   : > { %v921_v29 = vpop.f32.mrf.mxu1  ;;  %v594_v30 = vpop.f32.mrf.mxu0 }
 0x1cc   : > { %825 = vst.msk [vmem:[%s1260_s30 + $0x38] sm:$0xff] %vm433_vm1, %v921_v29  ;;  %830 = vst.msk [vmem:[%s1260_s30 + $0x40] sm:$0xff] %vm433_vm1, %v594_v30 }
 0x1cd   : > { %v514_v31 = vpop.f32.mrf.mxu1  ;;  %v931_v32 = vpop.f32.mrf.mxu0 }
 0x1ce   : > { %824 = vst.msk [vmem:[%s1260_s30 + $0x30] sm:$0xff] %vm433_vm1, %v514_v31  ;;  %833 = vst.msk [vmem:[%s1260_s30 + $0x58] sm:$0xff] %vm433_vm1, %v931_v32 }
 0x1cf   : > { %v938_v33 = vpop.f32.mrf.mxu1  ;;  %v604_v34 = vpop.f32.mrf.mxu0 }
 0x1d0   : > { %839 = vst.msk [vmem:[%s1260_s30 + $0x68] sm:$0xff] %vm433_vm1, %v938_v33  ;;  %832 = vst.msk [vmem:[%s1260_s30 + $0x50] sm:$0xff] %vm433_vm1, %v604_v34 }
 0x1d1   : > { %v684_v35 = vpop.f32.mrf.mxu1 }
 0x1d2   : > { %838 = vst.msk [vmem:[%s1260_s30 + $0x60] sm:$0xff] %vm433_vm1, %v684_v35 }
 0x1d3   : > { %v941_v36 = vpop.f32.mrf.mxu1 }
 0x1d4   : > { %841 = vst.msk [vmem:[%s1260_s30 + $0x78] sm:$0xff] %vm433_vm1, %v941_v36 }
 0x1d5   : > { %v694_v37 = vpop.f32.mrf.mxu1 }
 0x1d6   : > { %840 = vst.msk [vmem:[%s1260_s30 + $0x70] sm:$0xff] %vm433_vm1, %v694_v37 }
 0x1d7   : > { %1033 = shalt.err (!%p1030_p10)
}
 0x1d8   : > { %s1034_s19 = scalar_lea.hbm %s1295_s6, 2048  ;;  %s1038_s26 = scalar_lea.hbm %s1347_s3, 4096 }
 0x1d9   : > { %p1035_p0 = scmp.ne.s32.totalorder %s1295_s6, %s1034_s19  ;;  %p1039_p1 = scmp.lt.s32.totalorder %s1295_s6, %s1347_s3 }
 0x1da   : > { %p1040_p3 = scmp.lt.s32.totalorder %s1038_s26, %s1034_s19 }
 0x1db   : > { %p1036_p2 = pnand %p1035_p0, %p1356_p12 }
 0x1dc   : > { %p1041_p6 = por %p1040_p3, %p1039_p1 }
 0x1dd   : > { %p1037_p9 = pneg %p1036_p2 }
 0x1df   : > { %p1042_p11 = pnand %p1041_p6, %p1037_p9 }
 0x1e1   : > { %1045 = shalt.err (!%p1042_p11)
}
 0x1e2   : > { %s1090_s29 = smov 128   ;;  %s1091_s30 = smov 8  }
 0x1e3   : > { %944 = dma.vmem_to_hbm [thread:$0]  (%p1356_p12), %s1297_s10, 2048, %s1295_s6, %s709_s16, %s1090_s29, %s1090_s29, %s1091_s30  }
 0x1e4 PF: > { %s738_s9 = sand.u32 1, %s1072_s12   ;;  %p1357_p13 = scmp.ne.s32.totalorder %s1353_s25, 0 }
 0x1e5   : > { %p1358_p4 = scmp.ge.s32.totalorder %s1084_s15, 2  ;;  %s739_s11 = scalar_lea.sflag [#allocation4], %s738_s9 }
 0x1e7   : > { %p951_p5 = pnand %p1358_p4, %p1357_p13 }
 0x1e9   : > { %p952_p7 = pneg %p951_p5 }
 0x1eb   : > { %1067 = dma.done.wait (%p952_p7), %s739_s11, 2048  }
 0x1ec   : > { %1069 = vsyncadd (%p952_p7), %s739_s11, 4294965248  ;;  %p16_p8 = scmp.ge.s32.totalorder %s1137_s18, 4   ;;  %s1359_s12 = smov %s1076_s13 }
 0x1ed   : > { %s1360_s13 = smov %s1080_s14  ;;  %s1361_s14 = smov %s1149_s21 }
 0x1ee   : > { %s1362_s15 = smov %s1137_s18  ;;  %18 = sbr.rel (!%p16_p8) target bundleno = 5 (0x5), region = 80 }
 0x1f3   :  { %744 = vsyncpa [#allocation3], 1 }
 0x1f4   :  { %746 = vsyncpa [#allocation3 + $0x1], 1 }
 0x1f5   :  { %747 = vsyncpa [#allocation4], 1 }
 0x1f6   :  { %749 = vsyncpa [#allocation4 + $0x1], 1 }

</bundles_post_ra>
